<compile_context>
chip_gen: v7x
topology: tpu7x:2x2x1
jax: 0.10.0
libtpu: 0.0.40
codegen_flags: <defaults>
</compile_context>

<pallas_src>
import functools
import math

import jax
import jax.numpy as jnp
from jax import lax
from jax.experimental import pallas as pl
from jax.experimental.pallas import tpu as pltpu

_LANE = 128
_SUB = 8          # f32 sublane tile
_CHUNK = 256      # inner accumulation slab (rows); multiple of 32 => legal for all dtypes


def _cdiv(a, b):
    return -(-a // b)


def _sq_diff_partial_kernel(o_ref, t_ref, acc_ref, *, rows_total, chunk, masked):
    """Accumulate per-(sublane, lane) partial sums of (o - t)^2 into acc_ref."""
    i = pl.program_id(1)  # streaming / reduction axis (last)

    @pl.when(i == 0)
    def _():
        acc_ref[...] = jnp.zeros_like(acc_ref)

    block_rows = o_ref.shape[0]
    n_chunks = block_rows // chunk
    # Global first row of this block (only used for ragged-tail masking).
    row0 = (pl.program_id(0) * pl.num_programs(1) + i) * block_rows

    def body(k, acc):
        r = pl.multiple_of(k * chunk, chunk)
        o = o_ref[pl.ds(r, chunk), :].astype(jnp.float32)
        t = t_ref[pl.ds(r, chunk), :].astype(jnp.float32)
        d = o - t
        sq = d * d
        if masked:
            rid = row0 + r + lax.broadcasted_iota(jnp.int32, (chunk, _LANE), 0)
            sq = jnp.where(rid < rows_total, sq, 0.0)
        # Fold the slab into a vreg-shaped (8, 128) partial with VPU adds only;
        # the single cross-lane reduce happens once in the wrapper epilogue.
        return acc + sq.reshape(chunk // _SUB, _SUB, _LANE).sum(axis=0)

    acc_ref[...] += lax.fori_loop(
        0, n_chunks, body, jnp.zeros((_SUB, _LANE), jnp.float32))


def frequency_loss(output, target, *, block_rows=8192, n_parallel=2):
    """Pallas TPU implementation of FrequencyLoss.forward (returns scalar f32)."""
    assert output.shape == target.shape
    assert output.ndim >= 2, "fft2 needs at least 2 dims"

    n_batch = int(math.prod(output.shape[:-2]))  # empty product -> 1
    n_elems = output.size

    o = output.reshape(-1)
    t = target.reshape(-1)

    itemsize = jnp.dtype(output.dtype).itemsize
    sub = {1: 32, 2: 16}.get(itemsize, _SUB)  # dtype-aware sublane packing

    rows = n_elems // _LANE       # complete lane-dense rows fed to the kernel
    total = jnp.zeros((), jnp.float32)
    main_elems = 0

    if rows >= sub:
        # ---------------- main Pallas path over a (rows, 128) view -------------
        max_br = (rows // sub) * sub                 # largest legal block <= rows
        br = max(sub, min(block_rows, max_br))
        br = (br // sub) * sub                       # multiple of the sublane pack
        chunk = min(_CHUNK, br)                      # inner slab; multiple of sub
        br = (br // chunk) * chunk                   # block is a whole # of slabs

        n_blocks = _cdiv(rows, br)
        n_par = max(1, min(n_parallel, n_blocks))
        steps = _cdiv(n_blocks, n_par)
        # Static flag: any ragged / overhang block that needs in-kernel masking?
        masked = (n_par * steps * br) > rows

        main_elems = rows * _LANE
        # Free reshape when numel % 128 == 0 (common case); otherwise a one-off
        # prefix slice (the <128-element tail is summed below).
        # TODO(synk): a manual-DMA 1-D path could avoid the prefix copy when
        # numel % 128 != 0.
        o2 = o[:main_elems].reshape(rows, _LANE)
        t2 = t[:main_elems].reshape(rows, _LANE)

        def in_map(c, i):
            # Clamp so grid overhang slots re-read the last block (their
            # contribution is masked to zero in-kernel); never an OOB index.
            return (jnp.minimum(c * steps + i, n_blocks - 1), 0)

        kernel = functools.partial(
            _sq_diff_partial_kernel, rows_total=rows, chunk=chunk, masked=masked)

        partials = pl.pallas_call(
            kernel,
            out_shape=jax.ShapeDtypeStruct((n_par * _SUB, _LANE), jnp.float32),
            grid_spec=pltpu.PrefetchScalarGridSpec(
                num_scalar_prefetch=0,
                grid=(n_par, steps),
                in_specs=[
                    pl.BlockSpec((br, _LANE), in_map),   # output tile
                    pl.BlockSpec((br, _LANE), in_map),   # target tile
                ],
                # Constant block index along the reduction axis -> VMEM-resident
                # (8, 128) accumulator per parallel slot.
                out_specs=pl.BlockSpec((_SUB, _LANE), lambda c, i: (c, 0)),
            ),
            compiler_params=pltpu.CompilerParams(
                dimension_semantics=("parallel", "arbitrary"),
                vmem_limit_bytes=32 * 1024 * 1024),
            cost_estimate=pl.CostEstimate(
                flops=3 * main_elems,
                transcendentals=0,
                bytes_accessed=2 * main_elems * itemsize
                + n_par * _SUB * _LANE * 4),
        )(o2, t2)

        total = total + jnp.sum(partials)

    if main_elems < n_elems:
        # Sub-tile tail (< 128 elements in the common case; the whole array only
        # when the input is smaller than one (sub, 128) tile). Plain XLA sum.
        ot = o[main_elems:].astype(jnp.float32)
        tt = t[main_elems:].astype(jnp.float32)
        total = total + jnp.sum((ot - tt) ** 2)

    return total / jnp.float32(2.0 * n_batch)


def _reference_loss(output, target):
    """Direct FFT-based reference matching the PyTorch module."""
    of = jnp.fft.fft2(output.astype(jnp.float32))
    tf = jnp.fft.fft2(target.astype(jnp.float32))
    diff_re = jnp.real(of) - jnp.real(tf)
    diff_im = jnp.imag(of) - jnp.imag(tf)
    return (jnp.sum(diff_re ** 2) + jnp.sum(diff_im ** 2)) / (2.0 * output.size)


if __name__ == "__main__":
    key = jax.random.PRNGKey(0)

    test_shapes = [
        (2, 4, 16, 16),   # divisible case: no masking, no tail
        (2, 3, 24, 40),   # ragged row-block: exercises in-kernel masking
        (2, 2, 10, 10),   # smaller than one tile: wrapper tail path
    ]
    for shape in test_shapes:
        key, k1, k2 = jax.random.split(key, 3)
        out_x = jax.random.normal(k1, shape, dtype=jnp.float32)
        tgt_x = jax.random.normal(k2, shape, dtype=jnp.float32)

        loss = frequency_loss(out_x, tgt_x)
        loss = jax.block_until_ready(loss)

        ref = _reference_loss(out_x, tgt_x)
        assert jnp.allclose(loss, ref, rtol=1e-4, atol=1e-4), (shape, loss, ref)

    print("KERNEL_OK")
</pallas_src>

<mosaic_0001>
module attributes {stable_mosaic.version = 11 : i64} {
  func.func @_sq_diff_partial_kernel(%arg0: i32, %arg1: i32, %arg2: memref<16x128xf32, #tpu.memory_space<vmem>>, %arg3: memref<16x128xf32, #tpu.memory_space<vmem>>, %arg4: memref<8x128xf32, #tpu.memory_space<vmem>>) attributes {dimension_semantics = [#tpu.dimension_semantics<parallel>, #tpu.dimension_semantics<arbitrary>], iteration_bounds = array<i64: 1, 1>, scalar_prefetch = 0 : i64, scratch_operands = 0 : i64, tpu.core_type = #tpu.core_type<tc>, window_params = [{transform_indices = @transform_0, window_bounds = array<i64: 16, 128>}, {transform_indices = @transform_1, window_bounds = array<i64: 16, 128>}, {transform_indices = @transform_2, window_bounds = array<i64: 8, 128>}]} {
    %c0_i32 = arith.constant 0 : i32
    %0 = arith.cmpi eq, %arg1, %c0_i32 : i32
    %1 = arith.extui %0 : i1 to i32
    %c0_i32_0 = arith.constant 0 : i32
    %2 = arith.cmpi ne, %1, %c0_i32_0 : i32
    scf.if %2 {
      %cst_8 = arith.constant 0.000000e+00 : f32
      %18 = vector.broadcast %cst_8 : f32 to vector<8x128xf32>
      %c0_9 = arith.constant 0 : index
      %c0_10 = arith.constant 0 : index
      %19 = vector.load %arg4[%c0_9, %c0_10] : memref<8x128xf32, #tpu.memory_space<vmem>>, vector<8x128xf32>
      tpu.vector_store %arg4[%c0_9, %c0_10], %18 {strides = array<i32>} : memref<8x128xf32, #tpu.memory_space<vmem>>, vector<8x128xf32>,
    } else {
    }
    %c0 = arith.constant 0 : index
    %c0_1 = arith.constant 0 : index
    %3 = vector.load %arg4[%c0, %c0_1] : memref<8x128xf32, #tpu.memory_space<vmem>>, vector<8x128xf32>
    %cst = arith.constant 0.000000e+00 : f32
    %4 = vector.broadcast %cst : f32 to vector<8x128xf32>
    %c0_i32_2 = arith.constant 0 : i32
    %c16_i32 = arith.constant 16 : i32
    %5 = arith.muli %c0_i32_2, %c16_i32 : i32
    %6 = tpu.assume_multiple %5, 16 : i32
    %7 = arith.index_cast %6 : i32 to index
    %c0_3 = arith.constant 0 : index
    %8 = vector.load %arg2[%7, %c0_3] : memref<16x128xf32, #tpu.memory_space<vmem>>, vector<16x128xf32>
    %9 = arith.index_cast %6 : i32 to index
    %c0_4 = arith.constant 0 : index
    %10 = vector.load %arg3[%9, %c0_4] : memref<16x128xf32, #tpu.memory_space<vmem>>, vector<16x128xf32>
    %11 = arith.subf %8, %10 : vector<16x128xf32>
    %12 = arith.mulf %11, %11 : vector<16x128xf32>
    %13 = vector.shape_cast %12 : vector<16x128xf32> to vector<2x8x128xf32>
    %cst_5 = arith.constant dense<0.000000e+00> : vector<8x128xf32>
    %14 = vector.multi_reduction <add>, %13, %cst_5 [0] : vector<2x8x128xf32> to vector<8x128xf32>
    %15 = arith.addf %4, %14 : vector<8x128xf32>
    %c1_i32 = arith.constant 1 : i32
    %16 = arith.addf %3, %15 : vector<8x128xf32>
    %c0_6 = arith.constant 0 : index
    %c0_7 = arith.constant 0 : index
    %17 = vector.load %arg4[%c0_6, %c0_7] : memref<8x128xf32, #tpu.memory_space<vmem>>, vector<8x128xf32>
    tpu.vector_store %arg4[%c0_6, %c0_7], %16 {strides = array<i32>} : memref<8x128xf32, #tpu.memory_space<vmem>>, vector<8x128xf32>,
    return
  }
  func.func @transform_0(%arg0: i32, %arg1: i32) -> (i32, i32) {
    %c1_i32 = arith.constant 1 : i32
    %0 = arith.muli %arg0, %c1_i32 : i32
    %1 = arith.addi %0, %arg1 : i32
    %c0_i32 = arith.constant 0 : i32
    %2 = arith.minsi %1, %c0_i32 : i32
    %c0_i32_0 = arith.constant 0 : i32
    %c0_i32_1 = arith.constant 0 : i32
    return %2, %c0_i32_0 : i32, i32
  }
  func.func @transform_1(%arg0: i32, %arg1: i32) -> (i32, i32) {
    %c1_i32 = arith.constant 1 : i32
    %0 = arith.muli %arg0, %c1_i32 : i32
    %1 = arith.addi %0, %arg1 : i32
    %c0_i32 = arith.constant 0 : i32
    %2 = arith.minsi %1, %c0_i32 : i32
    %c0_i32_0 = arith.constant 0 : i32
    %c0_i32_1 = arith.constant 0 : i32
    return %2, %c0_i32_0 : i32, i32
  }
  func.func @transform_2(%arg0: i32, %arg1: i32) -> (i32, i32) {
    %c0_i32 = arith.constant 0 : i32
    %c0_i32_0 = arith.constant 0 : i32
    return %arg0, %c0_i32 : i32, i32
  }
}

</mosaic_0001>

<bundles_post_ra>
// kernel: tpu_custom_call.1
= control target key start
LH: loop header
LB: loop body
LE: loop exit
PB: predicated region body
PF: predicated region fallthrough
CT: control target
= control target key end

     0   :  { %7 = vsyncpa [#allocation3], 0  ;;  %s232_s0 = inlined_call_operand.hbm [shape: f32[16,128], index: 0, kind: input, shape index: {}]   ;;  %s233_s1 = inlined_call_operand.hbm [shape: f32[16,128], index: 1, kind: input, shape index: {}]   ;;  %s234_s2 = inlined_call_operand.hbm [shape: f32[8,128], index: 2, kind: output, shape index: {}]  }
   0x1   :  { %8 = vsyncpa [#allocation6], 0 }
   0x2   :  { %9 = vsyncpa [#allocation4], 0  ;;  %s176_s9 = smov [#allocation2]   ;;  %s104_s13 = scalar_lea.hbm %s232_s0, 256 }
   0x3   :  { %s21_s10 = sshll.u32 %s176_s9, 4  ;;  %p105_p0 = scmp.ne.s32.totalorder %s232_s0, %s104_s13  ;;  %s22_s10 = int_to_ptr.vmem [resolvable:$true] %s21_s10 }
   0x4   :  { %p108_p1 = scmp.lt.u32.totalorder %s104_s13, %s232_s0 }
   0x6   :  { %p110_p2 = pnand %p108_p1, %p105_p0 }
   0x8   :  { %113 = shalt.err (!%p110_p2)
}
   0x9   :  { %s114_s18 = scalar_lea.vmem %s22_s10, 256  ;;  %p119_p4 = scmp.lt.s32.totalorder %s22_s10, %s22_s10 }
   0xa   :  { %p115_p3 = scmp.ne.s32.totalorder %s22_s10, %s114_s18  ;;  %p120_p5 = scmp.lt.s32.totalorder %s114_s18, %s114_s18 }
   0xc   :  { %p121_p6 = por %p120_p5, %p119_p4 }
   0xe   :  { %p122_p7 = pnand %p121_p6, %p115_p3 }
  0x10   :  { %125 = shalt.err (!%p122_p7)
}
  0x11   :  { %s177_s19 = smov 128   ;;  %s178_s20 = smov 8  }
  0x12   :  { %27 = dma.hbm_to_vmem [thread:$0]  %s232_s0, 256, %s22_s10, [#allocation3], %s177_s19, %s177_s19, %s178_s20  }
  0x13   :  { %s179_s23 = smov [#allocation5]   ;;  %s126_s27 = scalar_lea.hbm %s233_s1, 256 }
  0x14   :  { %s39_s24 = sshll.u32 %s179_s23, 4  ;;  %p127_p8 = scmp.ne.s32.totalorder %s233_s1, %s126_s27  ;;  %s40_s24 = int_to_ptr.vmem [resolvable:$true] %s39_s24 }
  0x15   :  { %p130_p9 = scmp.lt.u32.totalorder %s126_s27, %s233_s1 }
  0x17   :  { %p132_p10 = pnand %p130_p9, %p127_p8 }
  0x19   :  { %135 = shalt.err (!%p132_p10)
}
  0x1a   :  { %s136_s4 = scalar_lea.vmem %s40_s24, 256  ;;  %p141_p12 = scmp.lt.s32.totalorder %s40_s24, %s40_s24 }
  0x1b   :  { %p137_p11 = scmp.ne.s32.totalorder %s40_s24, %s136_s4  ;;  %p142_p13 = scmp.lt.s32.totalorder %s136_s4, %s136_s4 }
  0x1d   :  { %p143_p0 = por %p142_p13, %p141_p12 }
  0x1f   :  { %p144_p1 = pnand %p143_p0, %p137_p11 }
  0x21   :  { %147 = shalt.err (!%p144_p1)
}
  0x22   :  { %45 = dma.hbm_to_vmem [thread:$0]  %s233_s1, 256, %s40_s24, [#allocation6], %s177_s19, %s177_s19, %s178_s20  }
  0x23   :  { %170 = dma.done.wait [#allocation3], 256  }
  0x24   :  { %171 = vsyncadd [#allocation3], 4294967040 }
  0x25   :  { %172 = dma.done.wait [#allocation6], 256  }
  0x26   :  { %173 = vsyncadd [#allocation6], 4294967040  ;;  %v66_v0 = vld [vmem:[#allocation2] sm:$0xff]  ;;  %v67_v1 = vld [vmem:[#allocation2 + $0x8] sm:$0xff]  ;;  %s180_s6 = smov [#allocation7]  }
  0x27   :  { %v68_v2 = vld [vmem:[#allocation5] sm:$0xff]  ;;  %v69_v3 = vld [vmem:[#allocation5 + $0x8] sm:$0xff]  ;;  %s84_s7 = sshll.u32 %s180_s6, 4  ;;  %s85_s7 = int_to_ptr.vmem [resolvable:$true] %s84_s7 }
  0x28   :  { %v70_v4 = vsub.f32 %v66_v0, %v68_v2  ;;  %v71_v5 = vsub.f32 %v67_v1, %v69_v3  ;;  %s148_s8 = scalar_lea.vmem %s85_s7, 128  ;;  %p153_p3 = scmp.lt.s32.totalorder %s85_s7, %s85_s7 }
  0x29   :  { %p149_p2 = scmp.ne.s32.totalorder %s85_s7, %s148_s8  ;;  %p154_p4 = scmp.lt.s32.totalorder %s148_s8, %s148_s8 }
  0x2a   :  { %v72_v6 = vmul.f32 %v70_v4, %v70_v4  ;;  %v73_v7 = vmul.f32 %v71_v5, %v71_v5 }
  0x2b   :  { %p155_p5 = por %p154_p4, %p153_p3 }
  0x2c   :  { %v74_v8 = vadd.f32 %v73_v7, %v72_v6 }
  0x2d   :  { %p156_p6 = pnand %p155_p5, %p149_p2 }
  0x2e   :  { %77 = vst [vmem:[#allocation7] sm:$0xff] %v74_v8 }
  0x2f   :  { %159 = shalt.err (!%p156_p6)
}
  0x30   :  { %s160_s10 = scalar_lea.hbm %s234_s2, 128 }
  0x31   :  { %p161_p7 = scmp.ne.s32.totalorder %s234_s2, %s160_s10  ;;  %p164_p8 = scmp.lt.u32.totalorder %s160_s10, %s234_s2 }
  0x33   :  { %p166_p9 = pnand %p164_p8, %p161_p7 }
  0x35   :  { %169 = shalt.err (!%p166_p9)
}
  0x36   :  { %87 = dma.vmem_to_hbm [thread:$0]  %s85_s7, 128, %s234_s2, [#allocation4]  }
  0x37   :  { %174 = dma.done.wait [#allocation4], 128  }
  0x38   :  { %175 = vsyncadd [#allocation4], 4294967168 }
  0x39   :  { %91 = vsyncpa [#allocation3], 1 }
  0x3a   :  { %92 = vsyncpa [#allocation6], 1 }
  0x3b   :  { %93 = vsyncpa [#allocation4], 1 }

</bundles_post_ra>
